<compile_context>
chip_gen: v7x
topology: tpu7x:2x2x1
jax: 0.10.0
libtpu: 0.0.40
codegen_flags: <defaults>
</compile_context>

<pallas_src>
import jax
import jax.numpy as jnp
from jax.experimental import pallas as pl
from jax.experimental.pallas import tpu as pltpu


def _round_up(n, m):
    return ((n + m - 1) // m) * m


def _device_kind():
    try:
        return jax.devices()[0].device_kind.lower()
    except Exception:
        return ""


def _vmem_capacity_bytes():
    try:
        return int(pltpu.get_tpu_info().vmem_capacity_bytes)
    except Exception:
        return 64 << 20   # conservative (v7x per-TC)


def mlp_kernel(alpha_ref,            # SMEM (2,) f32 — PReLU slopes (scalar prefetch)
               x_ref,                # VMEM (TB, D_in_p) bf16
               w1_ref, b1_ref,       # VMEM (D_in_p, H_p) bf16 / (1, H_p) f32
               w2_ref, b2_ref,       # VMEM (H_p,   H_p) bf16 / (1, H_p) f32
               w3_ref, b3_ref,       # VMEM (H_p,   O_p) bf16 / (1, O_p) f32
               o_ref):               # VMEM (TB, O_p)
    a1 = alpha_ref[0]
    a2 = alpha_ref[1]

    x = x_ref[...]

    # Layer 1: Linear -> Dropout (eval: identity) -> PReLU  (bias/PReLU in f32)
    h1 = jnp.dot(x, w1_ref[...], preferred_element_type=jnp.float32) + b1_ref[...]
    h1 = jnp.where(h1 > 0, h1, a1 * h1)

    # Layer 2: Linear -> Dropout (eval: identity) -> PReLU
    h2 = jnp.dot(h1.astype(w2_ref.dtype), w2_ref[...],
                 preferred_element_type=jnp.float32) + b2_ref[...]
    h2 = jnp.where(h2 > 0, h2, a2 * h2)

    # Layer 3: Linear
    o_ref[...] = (jnp.dot(h2.astype(w3_ref.dtype), w3_ref[...],
                          preferred_element_type=jnp.float32)
                  + b3_ref[...]).astype(o_ref.dtype)


def mlp_forward(x, params, *, block_b=None, out_dtype=jnp.float32):
    w1, b1 = params["w1"], params["b1"]
    w2, b2 = params["w2"], params["b2"]
    w3, b3 = params["w3"], params["b3"]
    alphas = params["alphas"]
    input_dim, hidden_dim, output_dim = params["dims"]

    B = x.shape[0]
    D_in_p, H_p = w1.shape
    O_p = w3.shape[1]
    out_itemsize = jnp.dtype(out_dtype).itemsize

    kind = _device_kind()
    if block_b is None:
        # v5e MXU is 128x128: TB=256 buys no MXU fill but doubles the f32
        # h1/h2 intermediates against its small scoped VMEM. v6e/v7x MXU is
        # 2x256^2: keep the M-tile at 256 to stay MXU-fed.
        block_b = 128 if "v5" in kind else 256

    B16 = _round_up(B, 16)                      # bf16 sublane pack
    if "v7" in kind and B16 > 16:
        # v7x has 2 TensorCores: make the (parallel) batch grid >= 2 steps.
        TB = min(block_b, _round_up(pl.cdiv(B, 2), 16))
    else:
        TB = min(block_b, B16)

    weight_bytes = ((w1.size + w2.size + w3.size) * 2
                    + (b1.size + b2.size + b3.size) * 4)

    def vmem_needed(tb, weight_bufs):
        stream = 2 * (tb * D_in_p * 2 + tb * O_p * out_itemsize)  # x/out double-buffered
        interm = 2 * tb * H_p * 4                                 # h1, h2 f32
        return weight_bufs * weight_bytes + stream + interm

    phys = _vmem_capacity_bytes()
    budget = int(0.80 * phys)                   # headroom for compiler scratch
    # Shrink the batch tile if resident weights + intermediates overshoot.
    while TB > 32 and vmem_needed(TB, 1) > budget:
        TB //= 2
    # TODO(synk): if vmem_needed(32, 1) still exceeds the budget (very large
    # hidden_dim on v7x's 64 MiB/TC), fall back to a K/N-tiled layer grid with
    # a pl.when-guarded accumulator instead of fully VMEM-resident weights.

    B_pad = _round_up(B, TB)
    nb = B_pad // TB

    # Pad input only when needed (feature lanes must be zero-padded; extra
    # batch rows are garbage-free zeros and are sliced off below).
    x_bf = x.astype(jnp.bfloat16)
    pad_b, pad_d = B_pad - B, D_in_p - input_dim
    if pad_b or pad_d:
        x_bf = jnp.pad(x_bf, ((0, pad_b), (0, pad_d)))

    flops = 2 * B_pad * (D_in_p * H_p + H_p * H_p + H_p * O_p)
    bytes_accessed = (x_bf.size * 2 + weight_bytes + B_pad * O_p * out_itemsize)

    xmap = lambda i, alphas_ref: (i, 0)   # x / out tiles walk the batch grid
    wmap = lambda i, alphas_ref: (0, 0)   # weights/biases stay VMEM-resident

    def build_and_run(single_buffer_weights):
        if single_buffer_weights:
            wspec = lambda shp: pl.BlockSpec(shp, wmap, pipeline_mode=pl.Buffered(1))
            weight_bufs = 1
        else:
            wspec = lambda shp: pl.BlockSpec(shp, wmap)
            weight_bufs = 2
        vmem_limit = min(
            max(int(1.2 * vmem_needed(TB, weight_bufs)) + (1 << 20), 32 << 20),
            phys)
        return pl.pallas_call(
            mlp_kernel,
            out_shape=jax.ShapeDtypeStruct((B_pad, O_p), out_dtype),
            grid_spec=pltpu.PrefetchScalarGridSpec(
                num_scalar_prefetch=1,
                grid=(nb,),
                in_specs=[
                    pl.BlockSpec((TB, D_in_p), xmap),   # x tile (double-buffered)
                    wspec((D_in_p, H_p)),               # w1 (resident)
                    wspec((1, H_p)),                    # b1
                    wspec((H_p, H_p)),                  # w2
                    wspec((1, H_p)),                    # b2
                    wspec((H_p, O_p)),                  # w3
                    wspec((1, O_p)),                    # b3
                ],
                out_specs=pl.BlockSpec((TB, O_p), xmap),
            ),
            compiler_params=pltpu.CompilerParams(
                dimension_semantics=("parallel",),      # shard batch across TCs (v7x)
                vmem_limit_bytes=vmem_limit,
            ),
            cost_estimate=pl.CostEstimate(
                flops=flops, transcendentals=0, bytes_accessed=bytes_accessed),
        )(alphas, x_bf, w1, b1, w2, b2, w3, b3)

    try:
        out_p = build_and_run(True)
    except Exception:
        # Some jax versions reject Buffered(1); fall back to default
        # double-buffered weights (2x weight VMEM, still correct).
        out_p = build_and_run(False)

    return out_p[:B, :output_dim]


def init_params(key, input_dim, hidden_dim, output_dim):
    """Deterministic init mirroring PyTorch defaults, stored padded to 128 lanes.
    Linear: U(-1/sqrt(fan_in), 1/sqrt(fan_in)) for weight and bias (weights kept
    transposed as (in, out) and cast to bf16). PReLU: slope 0.25 per layer."""
    D_in_p = _round_up(input_dim, 128)
    H_p = _round_up(hidden_dim, 128)
    O_p = _round_up(output_dim, 128)

    k = jax.random.split(key, 6)

    def linear(kw, kb, fan_in, fan_out, fan_in_p, fan_out_p):
        bound = 1.0 / (fan_in ** 0.5)
        w = jax.random.uniform(kw, (fan_in, fan_out), jnp.float32, -bound, bound)
        b = jax.random.uniform(kb, (1, fan_out), jnp.float32, -bound, bound)
        wp = jnp.zeros((fan_in_p, fan_out_p), jnp.bfloat16)
        wp = wp.at[:fan_in, :fan_out].set(w.astype(jnp.bfloat16))
        bp = jnp.zeros((1, fan_out_p), jnp.float32).at[:, :fan_out].set(b)
        return wp, bp

    w1, b1 = linear(k[0], k[1], input_dim, hidden_dim, D_in_p, H_p)
    w2, b2 = linear(k[2], k[3], hidden_dim, hidden_dim, H_p, H_p)
    w3, b3 = linear(k[4], k[5], hidden_dim, output_dim, H_p, O_p)
    alphas = jnp.full((2,), 0.25, jnp.float32)   # PReLU slopes (PyTorch init)

    return dict(w1=w1, b1=b1, w2=w2, b2=b2, w3=w3, b3=b3, alphas=alphas,
                dims=(input_dim, hidden_dim, output_dim))


def reference_forward(x, params):
    """Pure-JAX reference on the same (padded, bf16) parameters; eval-mode dropout.
    Note: this validates the kernel math, not bf16-vs-f32 PyTorch weight error."""
    w1, b1 = params["w1"], params["b1"]
    w2, b2 = params["w2"], params["b2"]
    w3, b3 = params["w3"], params["b3"]
    alphas = params["alphas"]
    input_dim, hidden_dim, output_dim = params["dims"]

    xb = x.astype(jnp.bfloat16)
    h = jnp.dot(xb, w1[:input_dim], preferred_element_type=jnp.float32) + b1
    h = jnp.where(h > 0, h, alphas[0] * h)
    h = jnp.dot(h.astype(jnp.bfloat16), w2, preferred_element_type=jnp.float32) + b2
    h = jnp.where(h > 0, h, alphas[1] * h)
    out = jnp.dot(h.astype(jnp.bfloat16), w3, preferred_element_type=jnp.float32) + b3
    return out[:, :output_dim]


if __name__ == "__main__":
    input_dim, hidden_dim, output_dim = 16, 32, 8
    batch = 8

    key = jax.random.PRNGKey(0)
    kx, kp = jax.random.split(key)
    x = jax.random.normal(kx, (batch, input_dim), jnp.float32)
    params = init_params(kp, input_dim, hidden_dim, output_dim)

    out = mlp_forward(x, params)
    out = jax.block_until_ready(out)

    ref = reference_forward(x, params)
    assert out.shape == (batch, output_dim), out.shape
    assert jnp.allclose(out, ref.astype(out.dtype), atol=5e-3, rtol=5e-3), \
        f"max err {jnp.max(jnp.abs(out - ref))}"

    print("KERNEL_OK")
</pallas_src>

<mosaic_0001>
module attributes {stable_mosaic.version = 11 : i64} {
  func.func @mlp_kernel(%arg0: i32, %arg1: memref<2xf32, #tpu.memory_space<smem>>, %arg2: memref<16x128xbf16, #tpu.memory_space<vmem>>, %arg3: memref<128x128xbf16, #tpu.memory_space<vmem>>, %arg4: memref<1x128xf32, #tpu.memory_space<vmem>>, %arg5: memref<128x128xbf16, #tpu.memory_space<vmem>>, %arg6: memref<1x128xf32, #tpu.memory_space<vmem>>, %arg7: memref<128x128xbf16, #tpu.memory_space<vmem>>, %arg8: memref<1x128xf32, #tpu.memory_space<vmem>>, %arg9: memref<16x128xf32, #tpu.memory_space<vmem>>) attributes {dimension_semantics = [#tpu.dimension_semantics<parallel>], iteration_bounds = array<i64: 1>, scalar_prefetch = 1 : i64, scratch_operands = 0 : i64, tpu.core_type = #tpu.core_type<tc>, window_params = [{transform_indices = @transform_0, window_bounds = array<i64: 16, 128>}, {pipeline_mode = #tpu.pipeline_mode<synchronous>, transform_indices = @transform_1, window_bounds = array<i64: 128, 128>}, {pipeline_mode = #tpu.pipeline_mode<synchronous>, transform_indices = @transform_2, window_bounds = array<i64: 1, 128>}, {pipeline_mode = #tpu.pipeline_mode<synchronous>, transform_indices = @transform_3, window_bounds = array<i64: 128, 128>}, {pipeline_mode = #tpu.pipeline_mode<synchronous>, transform_indices = @transform_4, window_bounds = array<i64: 1, 128>}, {pipeline_mode = #tpu.pipeline_mode<synchronous>, transform_indices = @transform_5, window_bounds = array<i64: 128, 128>}, {pipeline_mode = #tpu.pipeline_mode<synchronous>, transform_indices = @transform_6, window_bounds = array<i64: 1, 128>}, {transform_indices = @transform_7, window_bounds = array<i64: 16, 128>}]} {
    %c0 = arith.constant 0 : index
    %0 = memref.load %arg1[%c0] : memref<2xf32, #tpu.memory_space<smem>>
    %c1 = arith.constant 1 : index
    %1 = memref.load %arg1[%c1] : memref<2xf32, #tpu.memory_space<smem>>
    %c0_0 = arith.constant 0 : index
    %c0_1 = arith.constant 0 : index
    %2 = vector.load %arg2[%c0_0, %c0_1] : memref<16x128xbf16, #tpu.memory_space<vmem>>, vector<16x128xbf16>
    %c0_2 = arith.constant 0 : index
    %c0_3 = arith.constant 0 : index
    %3 = vector.load %arg3[%c0_2, %c0_3] : memref<128x128xbf16, #tpu.memory_space<vmem>>, vector<128x128xbf16>
    %cst = arith.constant dense<0.000000e+00> : vector<16x128xf32>
    %4 = tpu.matmul %2, %3, %cst {dimension_numbers = #tpu.dot_dimension_numbers<[1], [0], [0], [1], [0, 0, 1, 1], [], []>} : vector<16x128xbf16>, vector<128x128xbf16>, vector<16x128xf32> -> vector<16x128xf32>
    %c0_4 = arith.constant 0 : index
    %c0_5 = arith.constant 0 : index
    %5 = vector.load %arg4[%c0_4, %c0_5] : memref<1x128xf32, #tpu.memory_space<vmem>>, vector<1x128xf32>
    %6 = vector.broadcast %5 : vector<1x128xf32> to vector<16x128xf32>
    %7 = arith.addf %4, %6 : vector<16x128xf32>
    %cst_6 = arith.constant 0.000000e+00 : f32
    %8 = vector.broadcast %cst_6 : f32 to vector<16x128xf32>
    %9 = arith.cmpf ogt, %7, %8 : vector<16x128xf32>
    %10 = vector.broadcast %0 : f32 to vector<16x128xf32>
    %11 = arith.mulf %10, %7 : vector<16x128xf32>
    %12 = arith.select %9, %7, %11 : vector<16x128xi1>, vector<16x128xf32>
    %13 = arith.truncf %12 : vector<16x128xf32> to vector<16x128xbf16>
    %c0_7 = arith.constant 0 : index
    %c0_8 = arith.constant 0 : index
    %14 = vector.load %arg5[%c0_7, %c0_8] : memref<128x128xbf16, #tpu.memory_space<vmem>>, vector<128x128xbf16>
    %cst_9 = arith.constant dense<0.000000e+00> : vector<16x128xf32>
    %15 = tpu.matmul %13, %14, %cst_9 {dimension_numbers = #tpu.dot_dimension_numbers<[1], [0], [0], [1], [0, 0, 1, 1], [], []>} : vector<16x128xbf16>, vector<128x128xbf16>, vector<16x128xf32> -> vector<16x128xf32>
    %c0_10 = arith.constant 0 : index
    %c0_11 = arith.constant 0 : index
    %16 = vector.load %arg6[%c0_10, %c0_11] : memref<1x128xf32, #tpu.memory_space<vmem>>, vector<1x128xf32>
    %17 = vector.broadcast %16 : vector<1x128xf32> to vector<16x128xf32>
    %18 = arith.addf %15, %17 : vector<16x128xf32>
    %cst_12 = arith.constant 0.000000e+00 : f32
    %19 = vector.broadcast %cst_12 : f32 to vector<16x128xf32>
    %20 = arith.cmpf ogt, %18, %19 : vector<16x128xf32>
    %21 = vector.broadcast %1 : f32 to vector<16x128xf32>
    %22 = arith.mulf %21, %18 : vector<16x128xf32>
    %23 = arith.select %20, %18, %22 : vector<16x128xi1>, vector<16x128xf32>
    %24 = arith.truncf %23 : vector<16x128xf32> to vector<16x128xbf16>
    %c0_13 = arith.constant 0 : index
    %c0_14 = arith.constant 0 : index
    %25 = vector.load %arg7[%c0_13, %c0_14] : memref<128x128xbf16, #tpu.memory_space<vmem>>, vector<128x128xbf16>
    %cst_15 = arith.constant dense<0.000000e+00> : vector<16x128xf32>
    %26 = tpu.matmul %24, %25, %cst_15 {dimension_numbers = #tpu.dot_dimension_numbers<[1], [0], [0], [1], [0, 0, 1, 1], [], []>} : vector<16x128xbf16>, vector<128x128xbf16>, vector<16x128xf32> -> vector<16x128xf32>
    %c0_16 = arith.constant 0 : index
    %c0_17 = arith.constant 0 : index
    %27 = vector.load %arg8[%c0_16, %c0_17] : memref<1x128xf32, #tpu.memory_space<vmem>>, vector<1x128xf32>
    %28 = vector.broadcast %27 : vector<1x128xf32> to vector<16x128xf32>
    %29 = arith.addf %26, %28 : vector<16x128xf32>
    %c0_18 = arith.constant 0 : index
    %c0_19 = arith.constant 0 : index
    %30 = vector.load %arg9[%c0_18, %c0_19] : memref<16x128xf32, #tpu.memory_space<vmem>>, vector<16x128xf32>
    tpu.vector_store %arg9[%c0_18, %c0_19], %29 {strides = array<i32>} : memref<16x128xf32, #tpu.memory_space<vmem>>, vector<16x128xf32>,
    return
  }
  func.func @transform_0(%arg0: i32, %arg1: memref<2xf32, #tpu.memory_space<smem>>) -> (i32, i32) {
    %c0_i32 = arith.constant 0 : i32
    %c0_i32_0 = arith.constant 0 : i32
    return %arg0, %c0_i32 : i32, i32
  }
  func.func @transform_1(%arg0: i32, %arg1: memref<2xf32, #tpu.memory_space<smem>>) -> (i32, i32) {
    %c0_i32 = arith.constant 0 : i32
    %c0_i32_0 = arith.constant 0 : i32
    %c0_i32_1 = arith.constant 0 : i32
    return %c0_i32, %c0_i32_0 : i32, i32
  }
  func.func @transform_2(%arg0: i32, %arg1: memref<2xf32, #tpu.memory_space<smem>>) -> (i32, i32) {
    %c0_i32 = arith.constant 0 : i32
    %c0_i32_0 = arith.constant 0 : i32
    %c0_i32_1 = arith.constant 0 : i32
    return %c0_i32, %c0_i32_0 : i32, i32
  }
  func.func @transform_3(%arg0: i32, %arg1: memref<2xf32, #tpu.memory_space<smem>>) -> (i32, i32) {
    %c0_i32 = arith.constant 0 : i32
    %c0_i32_0 = arith.constant 0 : i32
    %c0_i32_1 = arith.constant 0 : i32
    return %c0_i32, %c0_i32_0 : i32, i32
  }
  func.func @transform_4(%arg0: i32, %arg1: memref<2xf32, #tpu.memory_space<smem>>) -> (i32, i32) {
    %c0_i32 = arith.constant 0 : i32
    %c0_i32_0 = arith.constant 0 : i32
    %c0_i32_1 = arith.constant 0 : i32
    return %c0_i32, %c0_i32_0 : i32, i32
  }
  func.func @transform_5(%arg0: i32, %arg1: memref<2xf32, #tpu.memory_space<smem>>) -> (i32, i32) {
    %c0_i32 = arith.constant 0 : i32
    %c0_i32_0 = arith.constant 0 : i32
    %c0_i32_1 = arith.constant 0 : i32
    return %c0_i32, %c0_i32_0 : i32, i32
  }
  func.func @transform_6(%arg0: i32, %arg1: memref<2xf32, #tpu.memory_space<smem>>) -> (i32, i32) {
    %c0_i32 = arith.constant 0 : i32
    %c0_i32_0 = arith.constant 0 : i32
    %c0_i32_1 = arith.constant 0 : i32
    return %c0_i32, %c0_i32_0 : i32, i32
  }
  func.func @transform_7(%arg0: i32, %arg1: memref<2xf32, #tpu.memory_space<smem>>) -> (i32, i32) {
    %c0_i32 = arith.constant 0 : i32
    %c0_i32_0 = arith.constant 0 : i32
    return %arg0, %c0_i32 : i32, i32
  }
}

module attributes {stable_mosaic.version = 11 : i64} {
  func.func @mlp_kernel(%arg0: i32, %arg1: memref<2xf32, #tpu.memory_space<smem>>, %arg2: memref<16x128xbf16, #tpu.memory_space<vmem>>, %arg3: memref<128x128xbf16, #tpu.memory_space<vmem>>, %arg4: memref<1x128xf32, #tpu.memory_space<vmem>>, %arg5: memref<128x128xbf16, #tpu.memory_space<vmem>>, %arg6: memref<1x128xf32, #tpu.memory_space<vmem>>, %arg7: memref<128x128xbf16, #tpu.memory_space<vmem>>, %arg8: memref<1x128xf32, #tpu.memory_space<vmem>>, %arg9: memref<16x128xf32, #tpu.memory_space<vmem>>) attributes {dimension_semantics = [#tpu.dimension_semantics<parallel>], iteration_bounds = array<i64: 1>, scalar_prefetch = 1 : i64, scratch_operands = 0 : i64, tpu.core_type = #tpu.core_type<tc>, window_params = [{transform_indices = @transform_0, window_bounds = array<i64: 16, 128>}, {pipeline_mode = #tpu.pipeline_mode<synchronous>, transform_indices = @transform_1, window_bounds = array<i64: 128, 128>}, {pipeline_mode = #tpu.pipeline_mode<synchronous>, transform_indices = @transform_2, window_bounds = array<i64: 1, 128>}, {pipeline_mode = #tpu.pipeline_mode<synchronous>, transform_indices = @transform_3, window_bounds = array<i64: 128, 128>}, {pipeline_mode = #tpu.pipeline_mode<synchronous>, transform_indices = @transform_4, window_bounds = array<i64: 1, 128>}, {pipeline_mode = #tpu.pipeline_mode<synchronous>, transform_indices = @transform_5, window_bounds = array<i64: 128, 128>}, {pipeline_mode = #tpu.pipeline_mode<synchronous>, transform_indices = @transform_6, window_bounds = array<i64: 1, 128>}, {transform_indices = @transform_7, window_bounds = array<i64: 16, 128>}]} {
    %c0 = arith.constant 0 : index
    %0 = memref.load %arg1[%c0] : memref<2xf32, #tpu.memory_space<smem>>
    %c1 = arith.constant 1 : index
    %1 = memref.load %arg1[%c1] : memref<2xf32, #tpu.memory_space<smem>>
    %c0_0 = arith.constant 0 : index
    %c0_1 = arith.constant 0 : index
    %2 = vector.load %arg2[%c0_0, %c0_1] : memref<16x128xbf16, #tpu.memory_space<vmem>>, vector<16x128xbf16>
    %c0_2 = arith.constant 0 : index
    %c0_3 = arith.constant 0 : index
    %3 = vector.load %arg3[%c0_2, %c0_3] : memref<128x128xbf16, #tpu.memory_space<vmem>>, vector<128x128xbf16>
    %cst = arith.constant dense<0.000000e+00> : vector<16x128xf32>
    %4 = tpu.matmul %2, %3, %cst {dimension_numbers = #tpu.dot_dimension_numbers<[1], [0], [0], [1], [0, 0, 1, 1], [], []>} : vector<16x128xbf16>, vector<128x128xbf16>, vector<16x128xf32> -> vector<16x128xf32>
    %c0_4 = arith.constant 0 : index
    %c0_5 = arith.constant 0 : index
    %5 = vector.load %arg4[%c0_4, %c0_5] : memref<1x128xf32, #tpu.memory_space<vmem>>, vector<1x128xf32>
    %6 = vector.broadcast %5 : vector<1x128xf32> to vector<16x128xf32>
    %7 = arith.addf %4, %6 : vector<16x128xf32>
    %cst_6 = arith.constant 0.000000e+00 : f32
    %8 = vector.broadcast %cst_6 : f32 to vector<16x128xf32>
    %9 = arith.cmpf ogt, %7, %8 : vector<16x128xf32>
    %10 = vector.broadcast %0 : f32 to vector<16x128xf32>
    %11 = arith.mulf %10, %7 : vector<16x128xf32>
    %12 = arith.select %9, %7, %11 : vector<16x128xi1>, vector<16x128xf32>
    %13 = arith.truncf %12 : vector<16x128xf32> to vector<16x128xbf16>
    %c0_7 = arith.constant 0 : index
    %c0_8 = arith.constant 0 : index
    %14 = vector.load %arg5[%c0_7, %c0_8] : memref<128x128xbf16, #tpu.memory_space<vmem>>, vector<128x128xbf16>
    %cst_9 = arith.constant dense<0.000000e+00> : vector<16x128xf32>
    %15 = tpu.matmul %13, %14, %cst_9 {dimension_numbers = #tpu.dot_dimension_numbers<[1], [0], [0], [1], [0, 0, 1, 1], [], []>} : vector<16x128xbf16>, vector<128x128xbf16>, vector<16x128xf32> -> vector<16x128xf32>
    %c0_10 = arith.constant 0 : index
    %c0_11 = arith.constant 0 : index
    %16 = vector.load %arg6[%c0_10, %c0_11] : memref<1x128xf32, #tpu.memory_space<vmem>>, vector<1x128xf32>
    %17 = vector.broadcast %16 : vector<1x128xf32> to vector<16x128xf32>
    %18 = arith.addf %15, %17 : vector<16x128xf32>
    %cst_12 = arith.constant 0.000000e+00 : f32
    %19 = vector.broadcast %cst_12 : f32 to vector<16x128xf32>
    %20 = arith.cmpf ogt, %18, %19 : vector<16x128xf32>
    %21 = vector.broadcast %1 : f32 to vector<16x128xf32>
    %22 = arith.mulf %21, %18 : vector<16x128xf32>
    %23 = arith.select %20, %18, %22 : vector<16x128xi1>, vector<16x128xf32>
    %24 = arith.truncf %23 : vector<16x128xf32> to vector<16x128xbf16>
    %c0_13 = arith.constant 0 : index
    %c0_14 = arith.constant 0 : index
    %25 = vector.load %arg7[%c0_13, %c0_14] : memref<128x128xbf16, #tpu.memory_space<vmem>>, vector<128x128xbf16>
    %cst_15 = arith.constant dense<0.000000e+00> : vector<16x128xf32>
    %26 = tpu.matmul %24, %25, %cst_15 {dimension_numbers = #tpu.dot_dimension_numbers<[1], [0], [0], [1], [0, 0, 1, 1], [], []>} : vector<16x128xbf16>, vector<128x128xbf16>, vector<16x128xf32> -> vector<16x128xf32>
    %c0_16 = arith.constant 0 : index
    %c0_17 = arith.constant 0 : index
    %27 = vector.load %arg8[%c0_16, %c0_17] : memref<1x128xf32, #tpu.memory_space<vmem>>, vector<1x128xf32>
    %28 = vector.broadcast %27 : vector<1x128xf32> to vector<16x128xf32>
    %29 = arith.addf %26, %28 : vector<16x128xf32>
    %c0_18 = arith.constant 0 : index
    %c0_19 = arith.constant 0 : index
    %30 = vector.load %arg9[%c0_18, %c0_19] : memref<16x128xf32, #tpu.memory_space<vmem>>, vector<16x128xf32>
    tpu.vector_store %arg9[%c0_18, %c0_19], %29 {strides = array<i32>} : memref<16x128xf32, #tpu.memory_space<vmem>>, vector<16x128xf32>,
    return
  }
  func.func @transform_0(%arg0: i32, %arg1: memref<2xf32, #tpu.memory_space<smem>>) -> (i32, i32) {
    %c0_i32 = arith.constant 0 : i32
    %c0_i32_0 = arith.constant 0 : i32
    return %arg0, %c0_i32 : i32, i32
  }
  func.func @transform_1(%arg0: i32, %arg1: memref<2xf32, #tpu.memory_space<smem>>) -> (i32, i32) {
    %c0_i32 = arith.constant 0 : i32
    %c0_i32_0 = arith.constant 0 : i32
    %c0_i32_1 = arith.constant 0 : i32
    return %c0_i32, %c0_i32_0 : i32, i32
  }
  func.func @transform_2(%arg0: i32, %arg1: memref<2xf32, #tpu.memory_space<smem>>) -> (i32, i32) {
    %c0_i32 = arith.constant 0 : i32
    %c0_i32_0 = arith.constant 0 : i32
    %c0_i32_1 = arith.constant 0 : i32
    return %c0_i32, %c0_i32_0 : i32, i32
  }
  func.func @transform_3(%arg0: i32, %arg1: memref<2xf32, #tpu.memory_space<smem>>) -> (i32, i32) {
    %c0_i32 = arith.constant 0 : i32
    %c0_i32_0 = arith.constant 0 : i32
    %c0_i32_1 = arith.constant 0 : i32
    return %c0_i32, %c0_i32_0 : i32, i32
  }
  func.func @transform_4(%arg0: i32, %arg1: memref<2xf32, #tpu.memory_space<smem>>) -> (i32, i32) {
    %c0_i32 = arith.constant 0 : i32
    %c0_i32_0 = arith.constant 0 : i32
    %c0_i32_1 = arith.constant 0 : i32
    return %c0_i32, %c0_i32_0 : i32, i32
  }
  func.func @transform_5(%arg0: i32, %arg1: memref<2xf32, #tpu.memory_space<smem>>) -> (i32, i32) {
    %c0_i32 = arith.constant 0 : i32
    %c0_i32_0 = arith.constant 0 : i32
    %c0_i32_1 = arith.constant 0 : i32
    return %c0_i32, %c0_i32_0 : i32, i32
  }
  func.func @transform_6(%arg0: i32, %arg1: memref<2xf32, #tpu.memory_space<smem>>) -> (i32, i32) {
    %c0_i32 = arith.constant 0 : i32
    %c0_i32_0 = arith.constant 0 : i32
    %c0_i32_1 = arith.constant 0 : i32
    return %c0_i32, %c0_i32_0 : i32, i32
  }
  func.func @transform_7(%arg0: i32, %arg1: memref<2xf32, #tpu.memory_space<smem>>) -> (i32, i32) {
    %c0_i32 = arith.constant 0 : i32
    %c0_i32_0 = arith.constant 0 : i32
    return %arg0, %c0_i32 : i32, i32
  }
}

</mosaic_0001>

<bundles_post_ra>
// kernel: tpu_custom_call.1
= control target key start
LH: loop header
LB: loop body
LE: loop exit
PB: predicated region body
PF: predicated region fallthrough
CT: control target
= control target key end

     0   :  { %s948_s0 = inlined_call_operand.hbm [shape: f32[2], index: 0, kind: input, shape index: {}]   ;;  %s949_s1 = inlined_call_operand.hbm [shape: bf16[16,128], index: 1, kind: input, shape index: {}]   ;;  %s950_s2 = inlined_call_operand.hbm [shape: bf16[128,128], index: 2, kind: input, shape index: {}]   ;;  %s951_s3 = inlined_call_operand.vmem [shape: f32[1,128], index: 3, kind: input, shape index: {}]   ;;  %s952_s4 = inlined_call_operand.hbm [shape: bf16[128,128], index: 4, kind: input, shape index: {}]   ;;  %s953_s5 = inlined_call_operand.vmem [shape: f32[1,128], index: 5, kind: input, shape index: {}]   ;;  %s954_s6 = inlined_call_operand.hbm [shape: bf16[128,128], index: 6, kind: input, shape index: {}]   ;;  %s955_s7 = inlined_call_operand.vmem [shape: f32[1,128], index: 7, kind: input, shape index: {}]   ;;  %s956_s8 = inlined_call_operand.hbm [shape: f32[16,128], index: 8, kind: output, shape index: {}]  }
   0x1   :  { %s624_s29 = scalar_lea.hbm %s948_s0, 16 }
   0x2   :  { %p625_p0 = scmp.ne.s32.totalorder %s948_s0, %s624_s29  ;;  %p628_p1 = scmp.lt.u32.totalorder %s624_s29, %s948_s0 }
   0x4   :  { %p630_p2 = pnand %p628_p1, %p625_p0 }
   0x6   :  { %633 = shalt.err (!%p630_p2)  }
   0x7   :  { %s754_s12 = smov [#allocation3]  }
   0x8   :  { %14 = dma.hbm_to_smem %s948_s0, 16, %s754_s12, [#allocation2] }
   0x9   :  { %744 = dma.done.wait [#allocation2], 16 }
   0xa   :  { %745 = vsyncadd [#allocation2], 4294967280 }
   0xb   :  { %16 = sfence }
   0xc   :  { %17 = vsyncpa [#allocation5], 0 }
   0xd   :  { %18 = vsyncpa [#allocation8], 0 }
   0xe   :  { %19 = vsyncpa [#allocation11], 0 }
   0xf   :  { %20 = vsyncpa [#allocation6], 0  ;;  %s755_s15 = smov [#allocation7]   ;;  %s756_s17 = smov [#allocation4]  }
  0x10   :  { %s38_s16 = sshll.u32 %s755_s15, 4  ;;  %s26_s18 = sshll.u32 %s756_s17, 4  ;;  %s39_s16 = int_to_ptr.vmem [resolvable:$true] %s38_s16  ;;  %s823_s18 = int_to_ptr.vmem [resolvable:$true] %s26_s18 }
  0x11   :  { %s634_s21 = scalar_lea.hbm %s950_s2, 1024 }
  0x12   :  { %p635_p3 = scmp.ne.s32.totalorder %s950_s2, %s634_s21  ;;  %p638_p4 = scmp.lt.u32.totalorder %s634_s21, %s950_s2 }
  0x14   :  { %p640_p5 = pnand %p638_p4, %p635_p3 }
  0x16   :  { %643 = shalt.err (!%p640_p5)
}
  0x17   :  { %s644_s25 = scalar_lea.vmem %s39_s16, 1024  ;;  %p649_p7 = scmp.lt.s32.totalorder %s39_s16, %s39_s16 }
  0x18   :  { %p645_p6 = scmp.ne.s32.totalorder %s39_s16, %s644_s25  ;;  %p650_p8 = scmp.lt.s32.totalorder %s644_s25, %s644_s25 }
  0x1a   :  { %p651_p9 = por %p650_p8, %p649_p7 }
  0x1c   :  { %p652_p10 = pnand %p651_p9, %p645_p6 }
  0x1e   :  { %655 = shalt.err (!%p652_p10)
}
  0x1f   :  { %s757_s26 = smov 64   ;;  %s758_s27 = smov 4  }
  0x20   :  { %44 = dma.hbm_to_vmem [thread:$0]  %s950_s2, 1024, %s39_s16, [#allocation8], %s757_s26, %s757_s26, %s758_s27  }
  0x21   :  { %s656_s10 = scalar_lea.hbm %s949_s1, 128 }
  0x22   :  { %p657_p11 = scmp.ne.s32.totalorder %s949_s1, %s656_s10  ;;  %p660_p12 = scmp.lt.u32.totalorder %s656_s10, %s949_s1 }
  0x24   :  { %p662_p13 = pnand %p660_p12, %p657_p11 }
  0x26   :  { %665 = shalt.err (!%p662_p13)
}
  0x27   :  { %s666_s15 = scalar_lea.vmem %s823_s18, 128  ;;  %p671_p1 = scmp.lt.s32.totalorder %s823_s18, %s823_s18 }
  0x28   :  { %p667_p0 = scmp.ne.s32.totalorder %s823_s18, %s666_s15  ;;  %p672_p2 = scmp.lt.s32.totalorder %s666_s15, %s666_s15 }
  0x2a   :  { %p673_p3 = por %p672_p2, %p671_p1 }
  0x2c   :  { %p674_p4 = pnand %p673_p3, %p667_p0 }
  0x2e   :  { %677 = shalt.err (!%p674_p4)
}
  0x2f   :  { %32 = dma.hbm_to_vmem [thread:$0]  %s949_s1, 128, %s823_s18, [#allocation5], %s757_s26, %s757_s26, %s758_s27  }
  0x30   :  { %s759_s17 = smov [#allocation9]   ;;  %s760_s20 = smov [#allocation10]  }
  0x31   :  { %s52_s19 = sshll.u32 %s759_s17, 4  ;;  %s66_s21 = sshll.u32 %s760_s20, 4  ;;  %s53_s19 = int_to_ptr.vmem [resolvable:$true] %s52_s19  ;;  %s860_s21 = int_to_ptr.vmem [resolvable:$true] %s66_s21 }
  0x32   :  { %s678_s23 = scalar_lea.hbm %s952_s4, 1024 }
  0x33   :  { %p679_p5 = scmp.ne.s32.totalorder %s952_s4, %s678_s23  ;;  %p682_p6 = scmp.lt.u32.totalorder %s678_s23, %s952_s4 }
  0x35   :  { %p684_p7 = pnand %p682_p6, %p679_p5 }
  0x37   :  { %687 = shalt.err (!%p684_p7)
}
  0x38   :  { %s688_s1 = scalar_lea.vmem %s53_s19, 1024  ;;  %p693_p9 = scmp.lt.s32.totalorder %s53_s19, %s53_s19 }
  0x39   :  { %p689_p8 = scmp.ne.s32.totalorder %s53_s19, %s688_s1  ;;  %p694_p10 = scmp.lt.s32.totalorder %s688_s1, %s688_s1 }
  0x3b   :  { %p695_p11 = por %p694_p10, %p693_p9 }
  0x3d   :  { %p696_p12 = pnand %p695_p11, %p689_p8 }
  0x3f   :  { %699 = shalt.err (!%p696_p12)
}
  0x40   :  { %58 = dma.hbm_to_vmem [thread:$0]  %s952_s4, 1024, %s53_s19, [#allocation8], %s757_s26, %s757_s26, %s758_s27  }
  0x41   :  { %s700_s11 = scalar_lea.hbm %s954_s6, 1024 }
  0x42   :  { %p701_p13 = scmp.ne.s32.totalorder %s954_s6, %s700_s11  ;;  %p704_p0 = scmp.lt.u32.totalorder %s700_s11, %s954_s6 }
  0x44   :  { %p706_p1 = pnand %p704_p0, %p701_p13 }
  0x46   :  { %709 = shalt.err (!%p706_p1)
}
  0x47   :  { %s710_s2 = scalar_lea.vmem %s860_s21, 1024  ;;  %p715_p3 = scmp.lt.s32.totalorder %s860_s21, %s860_s21 }
  0x48   :  { %p711_p2 = scmp.ne.s32.totalorder %s860_s21, %s710_s2  ;;  %p716_p4 = scmp.lt.s32.totalorder %s710_s2, %s710_s2 }
  0x4a   :  { %p717_p5 = por %p716_p4, %p715_p3 }
  0x4c   :  { %p718_p6 = pnand %p717_p5, %p711_p2 }
  0x4e   :  { %721 = shalt.err (!%p718_p6)
}
  0x4f   :  { %72 = dma.hbm_to_vmem [thread:$0]  %s954_s6, 1024, %s860_s21, [#allocation11], %s757_s26, %s757_s26, %s758_s27  }
  0x50   :  { %746 = dma.done.wait [#allocation5], 128  }
  0x51   :  { %747 = vsyncadd [#allocation5], 4294967168 }
  0x52   :  { %748 = dma.done.wait [#allocation8], 2048  }
  0x53   :  { %749 = vsyncadd [#allocation8], 4294965248 }
  0x54   :  { %750 = dma.done.wait [#allocation11], 1024  }
  0x55   :  { %751 = vsyncadd [#allocation11], 4294966272  ;;  %v761_v0 = vmov 0.0   ;;  %vm762_vm0 = vmmov 0   ;;  %v599_v1 = vld [vmem:[#allocation7] sm:$0xff]   ;;  %v600_v2 = vld [vmem:[#allocation7 + $0x8] sm:$0xff]  }
  0x56   :  { %527 = vmatprep.subr.bf16.mxu0 %v761_v0  ;;  %543 = vmatprep.mubr.msk.bf16.mxu0 %vm762_vm0, %v761_v0  ;;  %v601_v3 = vld [vmem:[#allocation7 + $0x10] sm:$0xff]   ;;  %v608_v4 = vld [vmem:[#allocation9] sm:$0xff]   ;;  %v602_v5 = vld [vmem:[#allocation7 + $0x18] sm:$0xff]   ;;  %s88_s6 = sld [smem:[#allocation3]] }
  0x57   :  { %547 = vmatprep.subr.bf16.mxu1 %v761_v0  ;;  %563 = vmatprep.mubr.msk.bf16.mxu1 %vm762_vm0, %v761_v0  ;;  %v609_v6 = vld [vmem:[#allocation9 + $0x8] sm:$0xff]   ;;  %v603_v7 = vld [vmem:[#allocation7 + $0x20] sm:$0xff]   ;;  %v610_v8 = vld [vmem:[#allocation9 + $0x10] sm:$0xff]  }
  0x58   :  { %528 = vmatpush3.bf16.msra.mxu0 %v599_v1  ;;  %548 = vmatpush3.bf16.msra.mxu1 %v608_v4  ;;  %v604_v9 = vld [vmem:[#allocation7 + $0x28] sm:$0xff]   ;;  %v611_v10 = vld [vmem:[#allocation9 + $0x18] sm:$0xff]   ;;  %v605_v11 = vld [vmem:[#allocation7 + $0x30] sm:$0xff]  }
  0x59   :  { %529 = vmatprep.subr.bf16.mxu0 %v761_v0  ;;  %549 = vmatprep.subr.bf16.mxu1 %v761_v0  ;;  %v612_v12 = vld [vmem:[#allocation9 + $0x20] sm:$0xff]   ;;  %v606_v13 = vld [vmem:[#allocation7 + $0x38] sm:$0xff]   ;;  %v613_v14 = vld [vmem:[#allocation9 + $0x28] sm:$0xff]  }
  0x5a   :  { %v607_v15 = vld [vmem:[#allocation4] sm:$0xff]   ;;  %v614_v16 = vld [vmem:[#allocation9 + $0x30] sm:$0xff]   ;;  %v616_v18 = vld [vmem:[#allocation10] sm:$0xff]  }
  0x5b   :  { %v615_v17 = vld [vmem:[#allocation9 + $0x38] sm:$0xff]   ;;  %v617_v19 = vld [vmem:[#allocation10 + $0x8] sm:$0xff]   ;;  %v618_v20 = vld [vmem:[#allocation10 + $0x10] sm:$0xff]  }
  0x5c   :  { %530 = vmatpush3.bf16.msra.mxu0 %v600_v2  ;;  %550 = vmatpush3.bf16.msra.mxu1 %v609_v6  ;;  %v619_v21 = vld [vmem:[#allocation10 + $0x18] sm:$0xff]   ;;  %v620_v22 = vld [vmem:[#allocation10 + $0x20] sm:$0xff]   ;;  %v621_v23 = vld [vmem:[#allocation10 + $0x28] sm:$0xff]   ;;  %v212_v26 = vstv %s88_s6 }
  0x5d   :  { %531 = vmatprep.subr.bf16.mxu0 %v761_v0  ;;  %551 = vmatprep.subr.bf16.mxu1 %v761_v0  ;;  %v472_v24 = vld [vmem:[%s951_s3] ss:$0 sm:$0xff]  ;;  %v622_v37 = vld [vmem:[#allocation10 + $0x30] sm:$0xff]   ;;  %s471_s3 = sld [smem:[#allocation3 + $0x1]] }
  0x5e   :  { %v623_v38 = vld [vmem:[#allocation10 + $0x38] sm:$0xff]  }
  0x5f   :  { %v482_v39 = vld [vmem:[%s953_s5] ss:$0 sm:$0xff]  ;;  %s763_s5 = smov [#allocation12]  }
  0x60   :  { %532 = vmatpush3.bf16.msra.mxu0 %v601_v3  ;;  %552 = vmatpush3.bf16.msra.mxu1 %v610_v8  ;;  %v491_v52 = vld [vmem:[%s955_s7] ss:$0 sm:$0xff]  ;;  %s457_s22 = sshll.u32 %s763_s5, 4  ;;  %s458_s22 = int_to_ptr.vmem [resolvable:$true] %s457_s22 }
  0x61   :  { %533 = vmatprep.subr.bf16.mxu0 %v761_v0  ;;  %553 = vmatprep.subr.bf16.mxu1 %v761_v0  ;;  %s722_s0 = scalar_lea.vmem %s458_s22, 256  ;;  %p727_p8 = scmp.lt.s32.totalorder %s458_s22, %s458_s22 }
  0x62   :  { %p723_p7 = scmp.ne.s32.totalorder %s458_s22, %s722_s0  ;;  %p728_p9 = scmp.lt.s32.totalorder %s722_s0, %s722_s0 }
  0x63   :  { %v332_v41 = vstv %s471_s3 }
  0x64   :  { %534 = vmatpush3.bf16.msra.mxu0 %v602_v5  ;;  %554 = vmatpush3.bf16.msra.mxu1 %v611_v10  ;;  %p729_p10 = por %p728_p9, %p727_p8 }
  0x65   :  { %535 = vmatprep.subr.bf16.mxu0 %v761_v0  ;;  %555 = vmatprep.subr.bf16.mxu1 %v761_v0 }
  0x66   :  { %p730_p11 = pnand %p729_p10, %p723_p7 }
  0x68   :  { %536 = vmatpush3.bf16.msra.mxu0 %v603_v7  ;;  %556 = vmatpush3.bf16.msra.mxu1 %v612_v12 }
  0x69   :  { %537 = vmatprep.subr.bf16.mxu0 %v761_v0  ;;  %557 = vmatprep.subr.bf16.mxu1 %v761_v0 }
  0x6c   :  { %538 = vmatpush3.bf16.msra.mxu0 %v604_v9  ;;  %558 = vmatpush3.bf16.msra.mxu1 %v613_v14 }
  0x6d   :  { %539 = vmatprep.subr.bf16.mxu0 %v761_v0  ;;  %559 = vmatprep.subr.bf16.mxu1 %v761_v0 }
  0x70   :  { %540 = vmatpush3.bf16.msra.mxu0 %v605_v11  ;;  %560 = vmatpush3.bf16.msra.mxu1 %v614_v16 }
  0x71   :  { %541 = vmatprep.subr.bf16.mxu0 %v761_v0  ;;  %561 = vmatprep.subr.bf16.mxu1 %v761_v0 }
  0x74   :  { %542 = vmatpush3.bf16.msra.mxu0 %v606_v13  ;;  %562 = vmatpush3.bf16.msra.mxu1 %v615_v17 }
  0x75   :  { %567 = vmatprep.subr.bf16.mxu0 %v761_v0 }
  0x77   :  { %544 = vmatmul.mubr.bf16.vlgmr.msra.gmra.mrb[0].mxu0 %v607_v15 }
  0x78   :  { %583 = vmatprep.mubr.msk.bf16.mxu0 %vm762_vm0, %v761_v0  ;;  %568 = vmatpush3.bf16.msra.mxu0 %v616_v18 }
  0x79   :  { %569 = vmatprep.subr.bf16.mxu0 %v761_v0 }
  0x7c   :  { %570 = vmatpush3.bf16.msra.mxu0 %v617_v19 }
  0x7d   :  { %571 = vmatprep.subr.bf16.mxu0 %v761_v0 }
  0x80   :  { %572 = vmatpush3.bf16.msra.mxu0 %v618_v20 }
  0x81   :  { %573 = vmatprep.subr.bf16.mxu0 %v761_v0 }
  0x84   :  { %574 = vmatpush3.bf16.msra.mxu0 %v619_v21 }
  0x85   :  { %575 = vmatprep.subr.bf16.mxu0 %v761_v0 }
  0x88   :  { %576 = vmatpush3.bf16.msra.mxu0 %v620_v22 }
  0x89   :  { %577 = vmatprep.subr.bf16.mxu0 %v761_v0 }
  0x8c   :  { %578 = vmatpush3.bf16.msra.mxu0 %v621_v23 }
  0x8d   :  { %579 = vmatprep.subr.bf16.mxu0 %v761_v0 }
  0x90   :  { %580 = vmatpush3.bf16.msra.mxu0 %v622_v37 }
  0x91   :  { %581 = vmatprep.subr.bf16.mxu0 %v761_v0 }
  0x94   :  { %582 = vmatpush3.bf16.msra.mxu0 %v623_v38 }
 0x14a   :  { %v203_v25 = vpop.f32.mrb[0].mxu0 }
 0x14b   :  { %v204_v27 = vadd.f32 %v472_v24, %v203_v25  ;;  %v545_v28 = vpop.f32.mrb[1].mxu0 }
 0x14c   :  { %v206_v29 = vpop.f32.mrb[2].mxu0 }
 0x14d   :  { %v213_v30 = vmul.f32 %v212_v26, %v204_v27  ;;  %v207_v31 = vadd.f32 %v472_v24, %v206_v29  ;;  %v546_v32 = vpop.f32.mrb[3].mxu0  ;;  %vm210_vm1 = vcmp.gt.f32.partialorder %v204_v27, 0.0 }
 0x14f   :  { %vm211_vm2 = vcmp.gt.f32.partialorder %v207_v31, 0.0  ;;  %v214_v33 = vmul.f32 %v212_v26, %v207_v31  ;;  %v215_v34 = vsel %vm210_vm1, %v204_v27, %v213_v30 }
 0x151   :  { %v216_v35 = vsel %vm211_vm2, %v207_v31, %v214_v33 }
 0x152   :  { %v217_v36 = vpack.c.bf16 %v216_v35, %v215_v34 }
 0x154   :  { %564 = vmatmul.mubr.bf16.vlgmr.msra.gmra.mrb[0].mxu1 %v217_v36 }
 0x227   :  { %v323_v40 = vpop.f32.mrb[0].mxu1 }
 0x228   :  { %v324_v42 = vadd.f32 %v482_v39, %v323_v40  ;;  %v565_v43 = vpop.f32.mrb[1].mxu1 }
 0x229   :  { %v326_v44 = vpop.f32.mrb[2].mxu1 }
 0x22a   :  { %v333_v45 = vmul.f32 %v332_v41, %v324_v42  ;;  %v327_v46 = vadd.f32 %v482_v39, %v326_v44  ;;  %v566_v47 = vpop.f32.mrb[3].mxu1  ;;  %vm330_vm3 = vcmp.gt.f32.partialorder %v324_v42, 0.0 }
 0x22c   :  { %vm331_vm4 = vcmp.gt.f32.partialorder %v327_v46, 0.0  ;;  %v334_v48 = vmul.f32 %v332_v41, %v327_v46  ;;  %v335_v49 = vsel %vm330_vm3, %v324_v42, %v333_v45 }
 0x22e   :  { %v336_v50 = vsel %vm331_vm4, %v327_v46, %v334_v48 }
 0x22f   :  { %v337_v51 = vpack.c.bf16 %v336_v50, %v335_v49 }
 0x231   :  { %584 = vmatmul.mubr.bf16.vlgmr.msra.gmra.mrb[4].mxu0 %v337_v51 }
 0x304   :  { %v443_v53 = vpop.f32.mrb[4].mxu0 }
 0x305   :  { %v444_v54 = vadd.f32 %v491_v52, %v443_v53  ;;  %v585_v55 = vpop.f32.mrb[5].mxu0 }
 0x306   :  { %v446_v56 = vpop.f32.mrb[6].mxu0 }
 0x307   :  { %450 = vst [vmem:[#allocation12] sm:$0xff] %v444_v54  ;;  %v447_v57 = vadd.f32 %v491_v52, %v446_v56  ;;  %v586_v58 = vpop.f32.mrb[7].mxu0 }
 0x309   :  { %451 = vst [vmem:[#allocation12 + $0x8] sm:$0xff] %v447_v57 }
 0x30a   :  { %733 = shalt.err (!%p730_p11)
}
 0x30b   :  { %s734_s24 = scalar_lea.hbm %s956_s8, 256 }
 0x30c   :  { %p735_p12 = scmp.ne.s32.totalorder %s956_s8, %s734_s24  ;;  %p738_p13 = scmp.lt.u32.totalorder %s734_s24, %s956_s8 }
 0x30e   :  { %p740_p0 = pnand %p738_p13, %p735_p12 }
 0x310   :  { %743 = shalt.err (!%p740_p0)
}
 0x311   :  { %s764_s18 = smov 128   ;;  %s765_s30 = smov 8  }
 0x312   :  { %463 = dma.vmem_to_hbm [thread:$0]  %s458_s22, 256, %s956_s8, [#allocation6], %s764_s18, %s764_s18, %s765_s30  }
 0x313   :  { %752 = dma.done.wait [#allocation6], 256  }
 0x314   :  { %753 = vsyncadd [#allocation6], 4294967040 }
 0x315   :  { %467 = vsyncpa [#allocation5], 1 }
 0x316   :  { %468 = vsyncpa [#allocation8], 1 }
 0x317   :  { %469 = vsyncpa [#allocation11], 1 }
 0x318   :  { %470 = vsyncpa [#allocation6], 1 }

// kernel: tpu_custom_call.1
= control target key start
LH: loop header
LB: loop body
LE: loop exit
PB: predicated region body
PF: predicated region fallthrough
CT: control target
= control target key end

     0   :  { %s948_s0 = inlined_call_operand.hbm [shape: f32[2], index: 0, kind: input, shape index: {}]   ;;  %s949_s1 = inlined_call_operand.hbm [shape: bf16[16,128], index: 1, kind: input, shape index: {}]   ;;  %s950_s2 = inlined_call_operand.hbm [shape: bf16[128,128], index: 2, kind: input, shape index: {}]   ;;  %s951_s3 = inlined_call_operand.vmem [shape: f32[1,128], index: 3, kind: input, shape index: {}]   ;;  %s952_s4 = inlined_call_operand.hbm [shape: bf16[128,128], index: 4, kind: input, shape index: {}]   ;;  %s953_s5 = inlined_call_operand.vmem [shape: f32[1,128], index: 5, kind: input, shape index: {}]   ;;  %s954_s6 = inlined_call_operand.hbm [shape: bf16[128,128], index: 6, kind: input, shape index: {}]   ;;  %s955_s7 = inlined_call_operand.vmem [shape: f32[1,128], index: 7, kind: input, shape index: {}]   ;;  %s956_s8 = inlined_call_operand.hbm [shape: f32[16,128], index: 8, kind: output, shape index: {}]  }
   0x1   :  { %s624_s29 = scalar_lea.hbm %s948_s0, 16 }
   0x2   :  { %p625_p0 = scmp.ne.s32.totalorder %s948_s0, %s624_s29  ;;  %p628_p1 = scmp.lt.u32.totalorder %s624_s29, %s948_s0 }
   0x4   :  { %p630_p2 = pnand %p628_p1, %p625_p0 }
   0x6   :  { %633 = shalt.err (!%p630_p2)  }
   0x7   :  { %s754_s12 = smov [#allocation3]  }
   0x8   :  { %14 = dma.hbm_to_smem %s948_s0, 16, %s754_s12, [#allocation2] }
   0x9   :  { %744 = dma.done.wait [#allocation2], 16 }
   0xa   :  { %745 = vsyncadd [#allocation2], 4294967280 }
   0xb   :  { %16 = sfence }
   0xc   :  { %17 = vsyncpa [#allocation5], 0 }
   0xd   :  { %18 = vsyncpa [#allocation8], 0 }
   0xe   :  { %19 = vsyncpa [#allocation11], 0 }
   0xf   :  { %20 = vsyncpa [#allocation6], 0  ;;  %s755_s15 = smov [#allocation7]   ;;  %s756_s17 = smov [#allocation4]  }
  0x10   :  { %s38_s16 = sshll.u32 %s755_s15, 4  ;;  %s26_s18 = sshll.u32 %s756_s17, 4  ;;  %s39_s16 = int_to_ptr.vmem [resolvable:$true] %s38_s16  ;;  %s823_s18 = int_to_ptr.vmem [resolvable:$true] %s26_s18 }
  0x11   :  { %s634_s21 = scalar_lea.hbm %s950_s2, 1024 }
  0x12   :  { %p635_p3 = scmp.ne.s32.totalorder %s950_s2, %s634_s21  ;;  %p638_p4 = scmp.lt.u32.totalorder %s634_s21, %s950_s2 }
  0x14   :  { %p640_p5 = pnand %p638_p4, %p635_p3 }
  0x16   :  { %643 = shalt.err (!%p640_p5)
}
  0x17   :  { %s644_s25 = scalar_lea.vmem %s39_s16, 1024  ;;  %p649_p7 = scmp.lt.s32.totalorder %s39_s16, %s39_s16 }
  0x18   :  { %p645_p6 = scmp.ne.s32.totalorder %s39_s16, %s644_s25  ;;  %p650_p8 = scmp.lt.s32.totalorder %s644_s25, %s644_s25 }
  0x1a   :  { %p651_p9 = por %p650_p8, %p649_p7 }
  0x1c   :  { %p652_p10 = pnand %p651_p9, %p645_p6 }
  0x1e   :  { %655 = shalt.err (!%p652_p10)
}
  0x1f   :  { %s757_s26 = smov 64   ;;  %s758_s27 = smov 4  }
  0x20   :  { %44 = dma.hbm_to_vmem [thread:$0]  %s950_s2, 1024, %s39_s16, [#allocation8], %s757_s26, %s757_s26, %s758_s27  }
  0x21   :  { %s656_s10 = scalar_lea.hbm %s949_s1, 128 }
  0x22   :  { %p657_p11 = scmp.ne.s32.totalorder %s949_s1, %s656_s10  ;;  %p660_p12 = scmp.lt.u32.totalorder %s656_s10, %s949_s1 }
  0x24   :  { %p662_p13 = pnand %p660_p12, %p657_p11 }
  0x26   :  { %665 = shalt.err (!%p662_p13)
}
  0x27   :  { %s666_s15 = scalar_lea.vmem %s823_s18, 128  ;;  %p671_p1 = scmp.lt.s32.totalorder %s823_s18, %s823_s18 }
  0x28   :  { %p667_p0 = scmp.ne.s32.totalorder %s823_s18, %s666_s15  ;;  %p672_p2 = scmp.lt.s32.totalorder %s666_s15, %s666_s15 }
  0x2a   :  { %p673_p3 = por %p672_p2, %p671_p1 }
  0x2c   :  { %p674_p4 = pnand %p673_p3, %p667_p0 }
  0x2e   :  { %677 = shalt.err (!%p674_p4)
}
  0x2f   :  { %32 = dma.hbm_to_vmem [thread:$0]  %s949_s1, 128, %s823_s18, [#allocation5], %s757_s26, %s757_s26, %s758_s27  }
  0x30   :  { %s759_s17 = smov [#allocation9]   ;;  %s760_s20 = smov [#allocation10]  }
  0x31   :  { %s52_s19 = sshll.u32 %s759_s17, 4  ;;  %s66_s21 = sshll.u32 %s760_s20, 4  ;;  %s53_s19 = int_to_ptr.vmem [resolvable:$true] %s52_s19  ;;  %s860_s21 = int_to_ptr.vmem [resolvable:$true] %s66_s21 }
  0x32   :  { %s678_s23 = scalar_lea.hbm %s952_s4, 1024 }
  0x33   :  { %p679_p5 = scmp.ne.s32.totalorder %s952_s4, %s678_s23  ;;  %p682_p6 = scmp.lt.u32.totalorder %s678_s23, %s952_s4 }
  0x35   :  { %p684_p7 = pnand %p682_p6, %p679_p5 }
  0x37   :  { %687 = shalt.err (!%p684_p7)
}
  0x38   :  { %s688_s1 = scalar_lea.vmem %s53_s19, 1024  ;;  %p693_p9 = scmp.lt.s32.totalorder %s53_s19, %s53_s19 }
  0x39   :  { %p689_p8 = scmp.ne.s32.totalorder %s53_s19, %s688_s1  ;;  %p694_p10 = scmp.lt.s32.totalorder %s688_s1, %s688_s1 }
  0x3b   :  { %p695_p11 = por %p694_p10, %p693_p9 }
  0x3d   :  { %p696_p12 = pnand %p695_p11, %p689_p8 }
  0x3f   :  { %699 = shalt.err (!%p696_p12)
}
  0x40   :  { %58 = dma.hbm_to_vmem [thread:$0]  %s952_s4, 1024, %s53_s19, [#allocation8], %s757_s26, %s757_s26, %s758_s27  }
  0x41   :  { %s700_s11 = scalar_lea.hbm %s954_s6, 1024 }
  0x42   :  { %p701_p13 = scmp.ne.s32.totalorder %s954_s6, %s700_s11  ;;  %p704_p0 = scmp.lt.u32.totalorder %s700_s11, %s954_s6 }
  0x44   :  { %p706_p1 = pnand %p704_p0, %p701_p13 }
  0x46   :  { %709 = shalt.err (!%p706_p1)
}
  0x47   :  { %s710_s2 = scalar_lea.vmem %s860_s21, 1024  ;;  %p715_p3 = scmp.lt.s32.totalorder %s860_s21, %s860_s21 }
  0x48   :  { %p711_p2 = scmp.ne.s32.totalorder %s860_s21, %s710_s2  ;;  %p716_p4 = scmp.lt.s32.totalorder %s710_s2, %s710_s2 }
  0x4a   :  { %p717_p5 = por %p716_p4, %p715_p3 }
  0x4c   :  { %p718_p6 = pnand %p717_p5, %p711_p2 }
  0x4e   :  { %721 = shalt.err (!%p718_p6)
}
  0x4f   :  { %72 = dma.hbm_to_vmem [thread:$0]  %s954_s6, 1024, %s860_s21, [#allocation11], %s757_s26, %s757_s26, %s758_s27  }
  0x50   :  { %746 = dma.done.wait [#allocation5], 128  }
  0x51   :  { %747 = vsyncadd [#allocation5], 4294967168 }
  0x52   :  { %748 = dma.done.wait [#allocation8], 2048  }
  0x53   :  { %749 = vsyncadd [#allocation8], 4294965248 }
  0x54   :  { %750 = dma.done.wait [#allocation11], 1024  }
  0x55   :  { %751 = vsyncadd [#allocation11], 4294966272  ;;  %v761_v0 = vmov 0.0   ;;  %vm762_vm0 = vmmov 0   ;;  %v599_v1 = vld [vmem:[#allocation7] sm:$0xff]   ;;  %v600_v2 = vld [vmem:[#allocation7 + $0x8] sm:$0xff]  }
  0x56   :  { %527 = vmatprep.subr.bf16.mxu0 %v761_v0  ;;  %543 = vmatprep.mubr.msk.bf16.mxu0 %vm762_vm0, %v761_v0  ;;  %v601_v3 = vld [vmem:[#allocation7 + $0x10] sm:$0xff]   ;;  %v608_v4 = vld [vmem:[#allocation9] sm:$0xff]   ;;  %v602_v5 = vld [vmem:[#allocation7 + $0x18] sm:$0xff]   ;;  %s88_s6 = sld [smem:[#allocation3]] }
  0x57   :  { %547 = vmatprep.subr.bf16.mxu1 %v761_v0  ;;  %563 = vmatprep.mubr.msk.bf16.mxu1 %vm762_vm0, %v761_v0  ;;  %v609_v6 = vld [vmem:[#allocation9 + $0x8] sm:$0xff]   ;;  %v603_v7 = vld [vmem:[#allocation7 + $0x20] sm:$0xff]   ;;  %v610_v8 = vld [vmem:[#allocation9 + $0x10] sm:$0xff]  }
  0x58   :  { %528 = vmatpush3.bf16.msra.mxu0 %v599_v1  ;;  %548 = vmatpush3.bf16.msra.mxu1 %v608_v4  ;;  %v604_v9 = vld [vmem:[#allocation7 + $0x28] sm:$0xff]   ;;  %v611_v10 = vld [vmem:[#allocation9 + $0x18] sm:$0xff]   ;;  %v605_v11 = vld [vmem:[#allocation7 + $0x30] sm:$0xff]  }
  0x59   :  { %529 = vmatprep.subr.bf16.mxu0 %v761_v0  ;;  %549 = vmatprep.subr.bf16.mxu1 %v761_v0  ;;  %v612_v12 = vld [vmem:[#allocation9 + $0x20] sm:$0xff]   ;;  %v606_v13 = vld [vmem:[#allocation7 + $0x38] sm:$0xff]   ;;  %v613_v14 = vld [vmem:[#allocation9 + $0x28] sm:$0xff]  }
  0x5a   :  { %v607_v15 = vld [vmem:[#allocation4] sm:$0xff]   ;;  %v614_v16 = vld [vmem:[#allocation9 + $0x30] sm:$0xff]   ;;  %v616_v18 = vld [vmem:[#allocation10] sm:$0xff]  }
  0x5b   :  { %v615_v17 = vld [vmem:[#allocation9 + $0x38] sm:$0xff]   ;;  %v617_v19 = vld [vmem:[#allocation10 + $0x8] sm:$0xff]   ;;  %v618_v20 = vld [vmem:[#allocation10 + $0x10] sm:$0xff]  }
  0x5c   :  { %530 = vmatpush3.bf16.msra.mxu0 %v600_v2  ;;  %550 = vmatpush3.bf16.msra.mxu1 %v609_v6  ;;  %v619_v21 = vld [vmem:[#allocation10 + $0x18] sm:$0xff]   ;;  %v620_v22 = vld [vmem:[#allocation10 + $0x20] sm:$0xff]   ;;  %v621_v23 = vld [vmem:[#allocation10 + $0x28] sm:$0xff]   ;;  %v212_v26 = vstv %s88_s6 }
  0x5d   :  { %531 = vmatprep.subr.bf16.mxu0 %v761_v0  ;;  %551 = vmatprep.subr.bf16.mxu1 %v761_v0  ;;  %v472_v24 = vld [vmem:[%s951_s3] ss:$0 sm:$0xff]  ;;  %v622_v37 = vld [vmem:[#allocation10 + $0x30] sm:$0xff]   ;;  %s471_s3 = sld [smem:[#allocation3 + $0x1]] }
  0x5e   :  { %v623_v38 = vld [vmem:[#allocation10 + $0x38] sm:$0xff]  }
  0x5f   :  { %v482_v39 = vld [vmem:[%s953_s5] ss:$0 sm:$0xff]  ;;  %s763_s5 = smov [#allocation12]  }
  0x60   :  { %532 = vmatpush3.bf16.msra.mxu0 %v601_v3  ;;  %552 = vmatpush3.bf16.msra.mxu1 %v610_v8  ;;  %v491_v52 = vld [vmem:[%s955_s7] ss:$0 sm:$0xff]  ;;  %s457_s22 = sshll.u32 %s763_s5, 4  ;;  %s458_s22 = int_to_ptr.vmem [resolvable:$true] %s457_s22 }
  0x61   :  { %533 = vmatprep.subr.bf16.mxu0 %v761_v0  ;;  %553 = vmatprep.subr.bf16.mxu1 %v761_v0  ;;  %s722_s0 = scalar_lea.vmem %s458_s22, 256  ;;  %p727_p8 = scmp.lt.s32.totalorder %s458_s22, %s458_s22 }
  0x62   :  { %p723_p7 = scmp.ne.s32.totalorder %s458_s22, %s722_s0  ;;  %p728_p9 = scmp.lt.s32.totalorder %s722_s0, %s722_s0 }
  0x63   :  { %v332_v41 = vstv %s471_s3 }
  0x64   :  { %534 = vmatpush3.bf16.msra.mxu0 %v602_v5  ;;  %554 = vmatpush3.bf16.msra.mxu1 %v611_v10  ;;  %p729_p10 = por %p728_p9, %p727_p8 }
  0x65   :  { %535 = vmatprep.subr.bf16.mxu0 %v761_v0  ;;  %555 = vmatprep.subr.bf16.mxu1 %v761_v0 }
  0x66   :  { %p730_p11 = pnand %p729_p10, %p723_p7 }
  0x68   :  { %536 = vmatpush3.bf16.msra.mxu0 %v603_v7  ;;  %556 = vmatpush3.bf16.msra.mxu1 %v612_v12 }
  0x69   :  { %537 = vmatprep.subr.bf16.mxu0 %v761_v0  ;;  %557 = vmatprep.subr.bf16.mxu1 %v761_v0 }
  0x6c   :  { %538 = vmatpush3.bf16.msra.mxu0 %v604_v9  ;;  %558 = vmatpush3.bf16.msra.mxu1 %v613_v14 }
  0x6d   :  { %539 = vmatprep.subr.bf16.mxu0 %v761_v0  ;;  %559 = vmatprep.subr.bf16.mxu1 %v761_v0 }
  0x70   :  { %540 = vmatpush3.bf16.msra.mxu0 %v605_v11  ;;  %560 = vmatpush3.bf16.msra.mxu1 %v614_v16 }
  0x71   :  { %541 = vmatprep.subr.bf16.mxu0 %v761_v0  ;;  %561 = vmatprep.subr.bf16.mxu1 %v761_v0 }
  0x74   :  { %542 = vmatpush3.bf16.msra.mxu0 %v606_v13  ;;  %562 = vmatpush3.bf16.msra.mxu1 %v615_v17 }
  0x75   :  { %567 = vmatprep.subr.bf16.mxu0 %v761_v0 }
  0x77   :  { %544 = vmatmul.mubr.bf16.vlgmr.msra.gmra.mrb[0].mxu0 %v607_v15 }
  0x78   :  { %583 = vmatprep.mubr.msk.bf16.mxu0 %vm762_vm0, %v761_v0  ;;  %568 = vmatpush3.bf16.msra.mxu0 %v616_v18 }
  0x79   :  { %569 = vmatprep.subr.bf16.mxu0 %v761_v0 }
  0x7c   :  { %570 = vmatpush3.bf16.msra.mxu0 %v617_v19 }
  0x7d   :  { %571 = vmatprep.subr.bf16.mxu0 %v761_v0 }
  0x80   :  { %572 = vmatpush3.bf16.msra.mxu0 %v618_v20 }
  0x81   :  { %573 = vmatprep.subr.bf16.mxu0 %v761_v0 }
  0x84   :  { %574 = vmatpush3.bf16.msra.mxu0 %v619_v21 }
  0x85   :  { %575 = vmatprep.subr.bf16.mxu0 %v761_v0 }
  0x88   :  { %576 = vmatpush3.bf16.msra.mxu0 %v620_v22 }
  0x89   :  { %577 = vmatprep.subr.bf16.mxu0 %v761_v0 }
  0x8c   :  { %578 = vmatpush3.bf16.msra.mxu0 %v621_v23 }
  0x8d   :  { %579 = vmatprep.subr.bf16.mxu0 %v761_v0 }
  0x90   :  { %580 = vmatpush3.bf16.msra.mxu0 %v622_v37 }
  0x91   :  { %581 = vmatprep.subr.bf16.mxu0 %v761_v0 }
  0x94   :  { %582 = vmatpush3.bf16.msra.mxu0 %v623_v38 }
 0x14a   :  { %v203_v25 = vpop.f32.mrb[0].mxu0 }
 0x14b   :  { %v204_v27 = vadd.f32 %v472_v24, %v203_v25  ;;  %v545_v28 = vpop.f32.mrb[1].mxu0 }
 0x14c   :  { %v206_v29 = vpop.f32.mrb[2].mxu0 }
 0x14d   :  { %v213_v30 = vmul.f32 %v212_v26, %v204_v27  ;;  %v207_v31 = vadd.f32 %v472_v24, %v206_v29  ;;  %v546_v32 = vpop.f32.mrb[3].mxu0  ;;  %vm210_vm1 = vcmp.gt.f32.partialorder %v204_v27, 0.0 }
 0x14f   :  { %vm211_vm2 = vcmp.gt.f32.partialorder %v207_v31, 0.0  ;;  %v214_v33 = vmul.f32 %v212_v26, %v207_v31  ;;  %v215_v34 = vsel %vm210_vm1, %v204_v27, %v213_v30 }
 0x151   :  { %v216_v35 = vsel %vm211_vm2, %v207_v31, %v214_v33 }
 0x152   :  { %v217_v36 = vpack.c.bf16 %v216_v35, %v215_v34 }
 0x154   :  { %564 = vmatmul.mubr.bf16.vlgmr.msra.gmra.mrb[0].mxu1 %v217_v36 }
 0x227   :  { %v323_v40 = vpop.f32.mrb[0].mxu1 }
 0x228   :  { %v324_v42 = vadd.f32 %v482_v39, %v323_v40  ;;  %v565_v43 = vpop.f32.mrb[1].mxu1 }
 0x229   :  { %v326_v44 = vpop.f32.mrb[2].mxu1 }
 0x22a   :  { %v333_v45 = vmul.f32 %v332_v41, %v324_v42  ;;  %v327_v46 = vadd.f32 %v482_v39, %v326_v44  ;;  %v566_v47 = vpop.f32.mrb[3].mxu1  ;;  %vm330_vm3 = vcmp.gt.f32.partialorder %v324_v42, 0.0 }
 0x22c   :  { %vm331_vm4 = vcmp.gt.f32.partialorder %v327_v46, 0.0  ;;  %v334_v48 = vmul.f32 %v332_v41, %v327_v46  ;;  %v335_v49 = vsel %vm330_vm3, %v324_v42, %v333_v45 }
 0x22e   :  { %v336_v50 = vsel %vm331_vm4, %v327_v46, %v334_v48 }
 0x22f   :  { %v337_v51 = vpack.c.bf16 %v336_v50, %v335_v49 }
 0x231   :  { %584 = vmatmul.mubr.bf16.vlgmr.msra.gmra.mrb[4].mxu0 %v337_v51 }
 0x304   :  { %v443_v53 = vpop.f32.mrb[4].mxu0 }
 0x305   :  { %v444_v54 = vadd.f32 %v491_v52, %v443_v53  ;;  %v585_v55 = vpop.f32.mrb[5].mxu0 }
 0x306   :  { %v446_v56 = vpop.f32.mrb[6].mxu0 }
 0x307   :  { %450 = vst [vmem:[#allocation12] sm:$0xff] %v444_v54  ;;  %v447_v57 = vadd.f32 %v491_v52, %v446_v56  ;;  %v586_v58 = vpop.f32.mrb[7].mxu0 }
 0x309   :  { %451 = vst [vmem:[#allocation12 + $0x8] sm:$0xff] %v447_v57 }
 0x30a   :  { %733 = shalt.err (!%p730_p11)
}
 0x30b   :  { %s734_s24 = scalar_lea.hbm %s956_s8, 256 }
 0x30c   :  { %p735_p12 = scmp.ne.s32.totalorder %s956_s8, %s734_s24  ;;  %p738_p13 = scmp.lt.u32.totalorder %s734_s24, %s956_s8 }
 0x30e   :  { %p740_p0 = pnand %p738_p13, %p735_p12 }
 0x310   :  { %743 = shalt.err (!%p740_p0)
}
 0x311   :  { %s764_s18 = smov 128   ;;  %s765_s30 = smov 8  }
 0x312   :  { %463 = dma.vmem_to_hbm [thread:$0]  %s458_s22, 256, %s956_s8, [#allocation6], %s764_s18, %s764_s18, %s765_s30  }
 0x313   :  { %752 = dma.done.wait [#allocation6], 256  }
 0x314   :  { %753 = vsyncadd [#allocation6], 4294967040 }
 0x315   :  { %467 = vsyncpa [#allocation5], 1 }
 0x316   :  { %468 = vsyncpa [#allocation8], 1 }
 0x317   :  { %469 = vsyncpa [#allocation11], 1 }
 0x318   :  { %470 = vsyncpa [#allocation6], 1 }

</bundles_post_ra>
